<compile_context>
chip_gen: v6e
topology: v6e:2x2x1
jax: 0.10.0
libtpu: 0.0.40
codegen_flags: <defaults>
</compile_context>

<pallas_src>
import functools

import jax
import jax.numpy as jnp
from jax.experimental import pallas as pl
from jax.experimental.pallas import tpu as pltpu


def _gap_kernel(x_ref, o_ref, acc_ref, *, inv_hw):
    # x_ref block: (R_tile, HW_tile); o_ref block: (R_tile, 1);
    # acc_ref: f32 VMEM scratch (R_tile, 1), resident across the HW reduction axis.
    k = pl.program_id(1)

    @pl.when(k == 0)
    def _init():
        acc_ref[...] = jnp.zeros_like(acc_ref)

    # Partial sum along the lane-dense HW axis, accumulated in f32 (works for
    # f32 and bf16 inputs alike; no explicit full-tile upcast copy).
    acc_ref[...] += jnp.sum(x_ref[...], axis=-1, keepdims=True, dtype=jnp.float32)

    @pl.when(k == pl.num_programs(1) - 1)
    def _finalize():
        o_ref[...] = (acc_ref[...] * inv_hw).astype(o_ref.dtype)


def _pick_tile(total, preferred, align):
    """Largest divisor of `total` that is a multiple of `align` and <= `preferred`.

    Falls back to `total` (full-extent block) if `total` isn't a multiple of
    `align`; a full-extent block always satisfies the (8, 128) layout rule.
    """
    if total % align != 0:
        return total
    t = min(preferred, total)
    t -= t % align
    while t >= align:
        if total % t == 0:
            return t
        t -= align
    return align


def global_avg_pool_2d(x, *, r_tile=None, hw_tile=None):
    """Equivalent of torch.mean(x, axis=(2, 3)) for an NCHW tensor."""
    n, c, h, w = x.shape
    hw = h * w
    rows = n * c

    # Free reshape for contiguous NCHW: rows (N*C) on sublanes, H*W on lanes.
    x2 = x.reshape(rows, hw)

    itemsize = jnp.dtype(x.dtype).itemsize
    if hw_tile is None:
        # Lane axis: as wide as possible (HBM-bound kernel), capped at 8192.
        hw_tile = _pick_tile(hw, 8192, 128)
    if r_tile is None:
        # Sublane axis: keep one input block ~<= 4 MiB (double-buffered by the
        # pipeline -> ~8 MiB of VMEM, well under scoped limits).
        budget_rows = max(8, (4 * 1024 * 1024) // (hw_tile * itemsize))
        r_tile = _pick_tile(rows, min(int(budget_rows), 1024), 8)

    grid = (rows // r_tile, hw // hw_tile)

    kernel = functools.partial(_gap_kernel, inv_hw=1.0 / float(hw))

    out = pl.pallas_call(
        kernel,
        out_shape=jax.ShapeDtypeStruct((rows, 1), x.dtype),
        grid=grid,
        in_specs=[pl.BlockSpec((r_tile, hw_tile), lambda i, k: (i, k))],
        out_specs=pl.BlockSpec((r_tile, 1), lambda i, k: (i, 0)),
        scratch_shapes=[pltpu.VMEM((r_tile, 1), jnp.float32)],
        compiler_params=pltpu.CompilerParams(
            dimension_semantics=("parallel", "arbitrary"),
        ),
    )(x2)

    return out.reshape(n, c)


if __name__ == "__main__":
    key = jax.random.PRNGKey(0)
    # Small NCHW input consistent with the module's forward.
    x = jax.random.normal(key, (2, 4, 16, 16), dtype=jnp.float32)

    out = global_avg_pool_2d(x)
    out = jax.block_until_ready(out)

    # Sanity check against plain-JAX reference.
    ref = jnp.mean(x, axis=(2, 3))
    assert out.shape == (2, 4)
    assert jnp.allclose(out, ref, atol=1e-5, rtol=1e-5)

    print("KERNEL_OK")
</pallas_src>

<mosaic_0001>
module attributes {stable_mosaic.version = 11 : i64} {
  func.func @_gap_kernel(%arg0: i32, %arg1: i32, %arg2: memref<8x256xf32, #tpu.memory_space<vmem>>, %arg3: memref<8x1xf32, #tpu.memory_space<vmem>>, %arg4: memref<8x1xf32, #tpu.memory_space<vmem>>) attributes {dimension_semantics = [#tpu.dimension_semantics<parallel>, #tpu.dimension_semantics<arbitrary>], iteration_bounds = array<i64: 1, 1>, scalar_prefetch = 0 : i64, scratch_operands = 1 : i64, tpu.core_type = #tpu.core_type<tc>, window_params = [{transform_indices = @transform_0, window_bounds = array<i64: 8, 256>}, {transform_indices = @transform_1, window_bounds = array<i64: 8, 1>}]} {
    %c0_i32 = arith.constant 0 : i32
    %0 = arith.cmpi eq, %arg1, %c0_i32 : i32
    %1 = arith.extui %0 : i1 to i32
    %c0_i32_0 = arith.constant 0 : i32
    %2 = arith.cmpi ne, %1, %c0_i32_0 : i32
    scf.if %2 {
      %cst_8 = arith.constant 0.000000e+00 : f32
      %12 = vector.broadcast %cst_8 : f32 to vector<8x1xf32>
      %c0_9 = arith.constant 0 : index
      %c0_10 = arith.constant 0 : index
      %13 = vector.load %arg4[%c0_9, %c0_10] : memref<8x1xf32, #tpu.memory_space<vmem>>, vector<8x1xf32>
      tpu.vector_store %arg4[%c0_9, %c0_10], %12 {strides = array<i32>} : memref<8x1xf32, #tpu.memory_space<vmem>>, vector<8x1xf32>,
    } else {
    }
    %c0 = arith.constant 0 : index
    %c0_1 = arith.constant 0 : index
    %3 = vector.load %arg4[%c0, %c0_1] : memref<8x1xf32, #tpu.memory_space<vmem>>, vector<8x1xf32>
    %c0_2 = arith.constant 0 : index
    %c0_3 = arith.constant 0 : index
    %4 = vector.load %arg2[%c0_2, %c0_3] : memref<8x256xf32, #tpu.memory_space<vmem>>, vector<8x256xf32>
    %cst = arith.constant dense<0.000000e+00> : vector<8xf32>
    %5 = vector.multi_reduction <add>, %4, %cst [1] : vector<8x256xf32> to vector<8xf32>
    %6 = vector.shape_cast %5 : vector<8xf32> to vector<8x1xf32>
    %7 = arith.addf %3, %6 : vector<8x1xf32>
    %c0_4 = arith.constant 0 : index
    %c0_5 = arith.constant 0 : index
    %8 = vector.load %arg4[%c0_4, %c0_5] : memref<8x1xf32, #tpu.memory_space<vmem>>, vector<8x1xf32>
    tpu.vector_store %arg4[%c0_4, %c0_5], %7 {strides = array<i32>} : memref<8x1xf32, #tpu.memory_space<vmem>>, vector<8x1xf32>,
    %c0_i32_6 = arith.constant 0 : i32
    %9 = arith.cmpi eq, %arg1, %c0_i32_6 : i32
    %10 = arith.extui %9 : i1 to i32
    %c0_i32_7 = arith.constant 0 : i32
    %11 = arith.cmpi ne, %10, %c0_i32_7 : i32
    scf.if %11 {
      %c0_8 = arith.constant 0 : index
      %c0_9 = arith.constant 0 : index
      %12 = vector.load %arg4[%c0_8, %c0_9] : memref<8x1xf32, #tpu.memory_space<vmem>>, vector<8x1xf32>
      %cst_10 = arith.constant 3.906250e-03 : f32
      %13 = vector.broadcast %cst_10 : f32 to vector<8x1xf32>
      %14 = arith.mulf %12, %13 : vector<8x1xf32>
      %c0_11 = arith.constant 0 : index
      %c0_12 = arith.constant 0 : index
      %15 = vector.load %arg3[%c0_11, %c0_12] : memref<8x1xf32, #tpu.memory_space<vmem>>, vector<8x1xf32>
      tpu.vector_store %arg3[%c0_11, %c0_12], %14 {strides = array<i32>} : memref<8x1xf32, #tpu.memory_space<vmem>>, vector<8x1xf32>,
    } else {
    }
    return
  }
  func.func @transform_0(%arg0: i32, %arg1: i32) -> (i32, i32) {
    %c0_i32 = arith.constant 0 : i32
    return %arg0, %arg1 : i32, i32
  }
  func.func @transform_1(%arg0: i32, %arg1: i32) -> (i32, i32) {
    %c0_i32 = arith.constant 0 : i32
    %c0_i32_0 = arith.constant 0 : i32
    return %arg0, %c0_i32 : i32, i32
  }
}

</mosaic_0001>

<bundles_post_ra>
// kernel: tpu_custom_call.1
= control target key start
LH: loop header
LB: loop body
LE: loop exit
PB: predicated region body
PF: predicated region fallthrough
CT: control target
= control target key end

     0   :  { %6 = vsyncpa [#allocation4], 0  ;;  %s70_s6 = smov [#allocation3]   ;;  %s88_s0 = inlined_call_operand.hbm [shape: f32[8,256], index: 0, kind: input, shape index: {}]   ;;  %s89_s1 = inlined_call_operand.vmem [shape: f32[8,1], index: 1, kind: output, shape index: {}]  }
   0x1   :  { %s13_s7 = sshll.u32 %s70_s6, 4  ;;  %s14_s7 = int_to_ptr.vmem [resolvable:$true] %s13_s7 }
   0x2   :  { %s56_s8 = scalar_lea.vmem %s14_s7, 256  ;;  %p61_p1 = scmp.lt.s32.totalorder %s14_s7, %s14_s7 }
   0x3   :  { %p57_p0 = scmp.ne.s32.totalorder %s14_s7, %s56_s8  ;;  %p62_p2 = scmp.lt.s32.totalorder %s56_s8, %s56_s8 }
   0x5   :  { %p63_p3 = por %p62_p2, %p61_p1 }
   0x7   :  { %p64_p4 = pnand %p63_p3, %p57_p0 }
   0x9   :  { %67 = shalt.err (!%p64_p4)
}
   0xa   :  { %16 = dma.hbm_to_vmem [thread:$0]  %s88_s0, 256, %s14_s7, [#allocation4]  }
   0xb   :  { %68 = dma.done.wait [#allocation4], 256  }
   0xc   :  { %69 = vsyncadd [#allocation4], 4294967040  ;;  %vm24_vm0 = vcmask 7168   ;;  %v71_v0 = vmov 0.0   ;;  %v27_v1 = vld [vmem:[#allocation3] sm:$0xff]  ;;  %v28_v2 = vld [vmem:[#allocation3 + $0x8] sm:$0xff] }
   0xd   :  { %25 = vst.msk [vmem:[#allocation2] sm:$0xff] %vm24_vm0, %v71_v0  ;;  %v29_v3 = vadd.f32 %v28_v2, %v27_v1 }
   0xf   :  { %30 = vadd.xlane.f32.xlu0 %v29_v3 }
  0x14   :  { %v26_v4 = vld [vmem:[#allocation2] sm:$0xff] }
  0x98   :  { %v31_v5 = vpop.xlane.xlu0 %30 }
  0x99   :  { %v32_v6 = vadd.f32 %v31_v5, %v26_v4 }
  0x9b   :  { %34 = vst.msk [vmem:[#allocation2] sm:$0xff] %vm24_vm0, %v32_v6 }
  0xa2   :  { %v38_v7 = vld [vmem:[#allocation2] sm:$0xff] }
  0xa3   :  { %v39_v8 = vmul.f32 0.00390625, %v38_v7 }
  0xa5   :  { %40 = vst.msk [vmem:[%s89_s1] sm:$0xff] %vm24_vm0, %v39_v8 }
  0xa6   :  { %45 = vsyncpa [#allocation4], 1 }

</bundles_post_ra>
